<compile_context>
chip_gen: v7x
topology: tpu7x:2x2x1
jax: 0.10.0
libtpu: 0.0.40
codegen_flags: <defaults>
</compile_context>

<pallas_src>
import math

import jax
import jax.numpy as jnp
from jax.experimental import pallas as pl
from jax.experimental.pallas import tpu as pltpu


def _pe_add_kernel(x_ref, pe_ref, o_ref):
    # x_ref / o_ref: (seq_tile, b_tile, D); pe_ref: (seq_tile, 1, D).
    # Pure HBM-bound streaming add; the sublane broadcast of pe over the batch
    # axis is VPU/XLU filler that hides completely under the DMA.
    o_ref[...] = x_ref[...] + pe_ref[...]


def make_positional_encoding(model_dimension: int, length: int, dtype=jnp.float32):
    """Deterministically build the `pe` buffer exactly like the PyTorch __init__.

    Works for odd model_dimension too (the cos half is truncated to D//2
    columns instead of raising, unlike the PyTorch original).
    """
    position = jnp.arange(0, length, dtype=jnp.float32)[:, None]            # (L, 1)
    div_term = jnp.exp(
        jnp.arange(0, model_dimension, 2, dtype=jnp.float32)
        * (-math.log(10000.0) / model_dimension)
    )                                                                        # (ceil(D/2),)
    args = position * div_term                                               # (L, ceil(D/2))
    pe = jnp.zeros((length, model_dimension), dtype=jnp.float32)
    pe = pe.at[:, 0::2].set(jnp.sin(args))
    pe = pe.at[:, 1::2].set(jnp.cos(args)[:, : model_dimension // 2])
    # unsqueeze(0).transpose(0, 1)  ->  (length, 1, model_dimension)
    pe = pe[None, :, :].transpose(1, 0, 2)
    return pe.astype(dtype)


def _cdiv(a: int, b: int) -> int:
    return -(-a // b)


def _vmem_capacity_bytes() -> int:
    try:
        return int(pltpu.get_tpu_info().vmem_capacity_bytes)
    except Exception:
        return 64 * 1024 * 1024  # assume the smallest part (v7x) if query unavailable


def _choose_tiles(S: int, B: int, D: int, itemsize: int, target_block_bytes: int):
    """Pick (seq_tile, b_tile) so one x block is ~target_block_bytes."""
    sub_b = 8 * max(1, 4 // max(itemsize, 1))      # 8 (f32), 16 (bf16), 32 (int8)
    row_bytes = B * D * itemsize                   # one (1, B, D) sequence row
    if row_bytes <= target_block_bytes:
        b_tile = B
        seq_tile = min(S, max(1, target_block_bytes // max(row_bytes, 1)))
    else:
        # One sequence row is already bigger than the budget: block the batch.
        seq_tile = 1
        if B > sub_b:
            b_tile = (target_block_bytes // max(D * itemsize, 1)) // sub_b * sub_b
            b_tile = int(min(B, max(sub_b, b_tile)))
        else:
            # Batch too small to split further; a single (1, B, D) row must fit.
            # TODO(synk): also block D (with a matching pe D-block) for the
            #             pathological huge-D / tiny-B case.
            b_tile = B
    return int(seq_tile), int(b_tile)


def positional_encoding_forward(
    x: jax.Array,
    pe: jax.Array,
    *,
    seq_tile: int | None = None,
    batch_tile: int | None = None,
    force_pallas: bool = False,
):
    """x: (S, B, D); pe: (L, 1, D) with L >= S.

    Returns x + pe[:S] broadcast over batch.  Dropout is identity (eval mode);
    see TODO at top of file for train-mode dropout.
    """
    S, B, D = x.shape
    assert pe.shape[0] >= S and pe.shape[1] == 1 and pe.shape[2] == D
    itemsize = jnp.dtype(x.dtype).itemsize
    pe_s = pe[:S].astype(x.dtype)                                  # (S, 1, D)
    total_bytes = S * B * D * itemsize

    # Tiny inputs: kernel launch / grid-step overhead dominates; let XLA fuse.
    if not force_pallas and total_bytes < (1 << 20):
        return x + pe_s

    vmem_cap = _vmem_capacity_bytes()
    # Per-operand block target: big enough to amortize the ~0.35us/step grid
    # overhead, small enough that 2x double-buffered (x, out, pe) fits well
    # inside the smallest physical VMEM (v7x 64 MiB -> ~5 MiB blocks,
    # v5e/v6e 128 MiB -> 8 MiB blocks).
    target_block_bytes = max(1 << 20, min(8 << 20, vmem_cap // 12))

    auto_tiles = seq_tile is None and batch_tile is None
    if seq_tile is None or batch_tile is None:
        st, bt = _choose_tiles(S, B, D, itemsize, target_block_bytes)
        seq_tile = st if seq_tile is None else seq_tile
        batch_tile = bt if batch_tile is None else batch_tile
    seq_tile = int(max(1, min(seq_tile, S)))
    batch_tile = int(max(1, min(batch_tile, B)))

    n_seq = _cdiv(S, seq_tile)
    n_b = _cdiv(B, batch_tile)

    # >= 2 pipelined steps per TensorCore (grid >= 4 on dual-TC v7x), but only
    # when there are enough bytes for the split to be worth its fixed cost.
    min_steps = 4 if total_bytes >= (4 << 20) else (2 if total_bytes >= (1 << 20) else 1)
    if auto_tiles and n_seq * n_b < min_steps and S > 1:
        want_seq = min(S, _cdiv(min_steps, n_b))
        seq_tile = _cdiv(S, want_seq)
        n_seq = _cdiv(S, seq_tile)

    # Real double-buffered VMEM need (+50% headroom); never below the 16 MiB
    # default, never above ~3/4 of physical VMEM.
    x_blk = seq_tile * batch_tile * D * itemsize
    pe_blk = seq_tile * D * itemsize
    need = 2 * (2 * x_blk + pe_blk)
    vmem_limit = int(min((vmem_cap * 3) // 4, max(16 << 20, need + need // 2)))
    vmem_limit = int(max(vmem_limit, need + (1 << 20)))
    vmem_limit = int(min(vmem_limit, vmem_cap - (2 << 20)))

    out = pl.pallas_call(
        _pe_add_kernel,
        out_shape=jax.ShapeDtypeStruct((S, B, D), x.dtype),
        grid_spec=pltpu.PrefetchScalarGridSpec(
            num_scalar_prefetch=0,
            grid=(n_seq, n_b),
            in_specs=[
                pl.BlockSpec((seq_tile, batch_tile, D), lambda i, j: (i, j, 0)),
                pl.BlockSpec((seq_tile, 1, D), lambda i, j: (i, 0, 0)),
            ],
            out_specs=pl.BlockSpec((seq_tile, batch_tile, D), lambda i, j: (i, j, 0)),
        ),
        compiler_params=pltpu.CompilerParams(
            dimension_semantics=("parallel", "parallel"),
            vmem_limit_bytes=vmem_limit,
        ),
        cost_estimate=pl.CostEstimate(
            flops=S * B * D,
            transcendentals=0,
            bytes_accessed=(2 * S * B * D + S * D) * itemsize,
        ),
        # x is dead after the add for typical callers (same shape/dtype as the
        # output): aliasing lets XLA reuse its buffer (free when donated,
        # a defensive copy otherwise).
        input_output_aliases={0: 0},
    )(x, pe_s)
    return out


if __name__ == "__main__":
    # Small shapes implied by the forward: x is (seq, batch, model_dimension)
    seq, batch, d_model = 16, 2, 32
    length = 32          # buffer length >= seq
    dropout_p = 0.1      # unused in eval mode

    key = jax.random.PRNGKey(0)
    x = jax.random.normal(key, (seq, batch, d_model), dtype=jnp.float32)

    pe = make_positional_encoding(d_model, length, dtype=jnp.float32)

    # Reference in plain JAX (computed first; the kernel output aliases x).
    ref = x + pe[:seq]

    # force_pallas=True so the tiny demo actually exercises the kernel
    # (the default path would take the fused-XLA fast path at this size).
    out = positional_encoding_forward(x, pe, force_pallas=True)
    out = jax.block_until_ready(out)

    assert out.shape == (seq, batch, d_model)
    assert jnp.allclose(out, ref, atol=1e-6, rtol=1e-6)

    print("KERNEL_OK")
</pallas_src>

<mosaic_0001>
module attributes {stable_mosaic.version = 11 : i64} {
  func.func @_pe_add_kernel(%arg0: i32, %arg1: i32, %arg2: memref<16x2x32xf32, #tpu.memory_space<vmem>>, %arg3: memref<16x1x32xf32, #tpu.memory_space<vmem>>, %arg4: memref<16x2x32xf32, #tpu.memory_space<vmem>>) attributes {dimension_semantics = [#tpu.dimension_semantics<parallel>, #tpu.dimension_semantics<parallel>], iteration_bounds = array<i64: 1, 1>, scalar_prefetch = 0 : i64, scratch_operands = 0 : i64, tpu.core_type = #tpu.core_type<tc>, window_params = [{transform_indices = @transform_0, window_bounds = array<i64: 16, 2, 32>}, {transform_indices = @transform_1, window_bounds = array<i64: 16, 1, 32>}, {transform_indices = @transform_2, window_bounds = array<i64: 16, 2, 32>}]} {
    %c0 = arith.constant 0 : index
    %c0_0 = arith.constant 0 : index
    %c0_1 = arith.constant 0 : index
    %0 = vector.load %arg2[%c0, %c0_0, %c0_1] : memref<16x2x32xf32, #tpu.memory_space<vmem>>, vector<16x2x32xf32>
    %c0_2 = arith.constant 0 : index
    %c0_3 = arith.constant 0 : index
    %c0_4 = arith.constant 0 : index
    %1 = vector.load %arg3[%c0_2, %c0_3, %c0_4] : memref<16x1x32xf32, #tpu.memory_space<vmem>>, vector<16x1x32xf32>
    %2 = vector.broadcast %1 : vector<16x1x32xf32> to vector<16x2x32xf32>
    %3 = arith.addf %0, %2 : vector<16x2x32xf32>
    %c0_5 = arith.constant 0 : index
    %c0_6 = arith.constant 0 : index
    %c0_7 = arith.constant 0 : index
    %4 = vector.load %arg4[%c0_5, %c0_6, %c0_7] : memref<16x2x32xf32, #tpu.memory_space<vmem>>, vector<16x2x32xf32>
    tpu.vector_store %arg4[%c0_5, %c0_6, %c0_7], %3 {strides = array<i32>} : memref<16x2x32xf32, #tpu.memory_space<vmem>>, vector<16x2x32xf32>,
    return
  }
  func.func @transform_0(%arg0: i32, %arg1: i32) -> (i32, i32, i32) {
    %c0_i32 = arith.constant 0 : i32
    %c0_i32_0 = arith.constant 0 : i32
    return %arg0, %arg1, %c0_i32 : i32, i32, i32
  }
  func.func @transform_1(%arg0: i32, %arg1: i32) -> (i32, i32, i32) {
    %c0_i32 = arith.constant 0 : i32
    %c0_i32_0 = arith.constant 0 : i32
    %c0_i32_1 = arith.constant 0 : i32
    return %arg0, %c0_i32, %c0_i32_0 : i32, i32, i32
  }
  func.func @transform_2(%arg0: i32, %arg1: i32) -> (i32, i32, i32) {
    %c0_i32 = arith.constant 0 : i32
    %c0_i32_0 = arith.constant 0 : i32
    return %arg0, %arg1, %c0_i32 : i32, i32, i32
  }
}

</mosaic_0001>

<bundles_post_ra>
// kernel: tpu_custom_call.1
= control target key start
LH: loop header
LB: loop body
LE: loop exit
PB: predicated region body
PF: predicated region fallthrough
CT: control target
= control target key end

     0   :  { %7 = vsyncpa [#allocation3], 0  ;;  %s388_s0 = inlined_call_operand.hbm [shape: f32[16,2,32], index: 0, kind: input, shape index: {}, may-alias: {0,2}]   ;;  %s389_s1 = inlined_call_operand.vmem [shape: f32[16,1,32], index: 1, kind: input, shape index: {}]   ;;  %s390_s2 = inlined_call_operand.hbm [shape: f32[16,2,32], index: 2, kind: output, shape index: {}, may-alias: {0,2}]  }
   0x1   :  { %8 = vsyncpa [#allocation4], 0  ;;  %s272_s9 = smov [#allocation2]   ;;  %s224_s13 = scalar_lea.hbm %s388_s0, 512 }
   0x2   :  { %s14_s10 = sshll.u32 %s272_s9, 4  ;;  %p225_p0 = scmp.ne.s32.totalorder %s388_s0, %s224_s13  ;;  %s15_s10 = int_to_ptr.vmem [resolvable:$true] %s14_s10 }
   0x3   :  { %p228_p1 = scmp.lt.u32.totalorder %s224_s13, %s388_s0 }
   0x5   :  { %p230_p2 = pnand %p228_p1, %p225_p0 }
   0x7   :  { %233 = shalt.err (!%p230_p2)
}
   0x8   :  { %s234_s18 = scalar_lea.vmem %s15_s10, 512  ;;  %p239_p4 = scmp.lt.s32.totalorder %s15_s10, %s15_s10 }
   0x9   :  { %p235_p3 = scmp.ne.s32.totalorder %s15_s10, %s234_s18  ;;  %p240_p5 = scmp.lt.s32.totalorder %s234_s18, %s234_s18 }
   0xb   :  { %p241_p6 = por %p240_p5, %p239_p4 }
   0xd   :  { %p242_p7 = pnand %p241_p6, %p235_p3 }
   0xf   :  { %245 = shalt.err (!%p242_p7)
}
  0x10   :  { %s273_s19 = smov 32   ;;  %s274_s20 = smov 2  }
  0x11   :  { %20 = dma.hbm_to_vmem [thread:$0]  %s388_s0, 512, %s15_s10, [#allocation3], %s273_s19, %s273_s19, %s274_s20  }
  0x12   :  { %268 = dma.done.wait [#allocation3], 512  }
  0x13   :  { %269 = vsyncadd [#allocation3], 4294966784  ;;  %vm170_vm0 = vcmask 254976   ;;  %s275_s23 = smov [#allocation5]   ;;  %v26_v0 = vld [vmem:[#allocation2] sm:$0x3] }
  0x14   :  { %s306_s24 = sshll.u32 %s275_s23, 4  ;;  %v204_v1 = vld [vmem:[%s389_s1] ss:$0 sm:$0xff]  ;;  %v27_v2 = vld [vmem:[#allocation2 + $0x2] sm:$0x3]  ;;  %s193_s24 = int_to_ptr.vmem [resolvable:$true] %s306_s24 }
  0x15   :  { %v154_v3 = vadd.f32 %v204_v1, %v26_v0  ;;  %v205_v4 = vld [vmem:[%s389_s1 + $0x1] ss:$0 sm:$0xff]  ;;  %v28_v5 = vld [vmem:[#allocation2 + $0x4] sm:$0x3]  ;;  %v206_v6 = vld [vmem:[%s389_s1 + $0x2] ss:$0 sm:$0xff]  ;;  %p251_p9 = scmp.lt.s32.totalorder %s193_s24, %s193_s24 }
  0x16   :  { %v155_v7 = vadd.f32 %v205_v4, %v27_v2  ;;  %v156_v8 = vadd.f32 %v206_v6, %v28_v5  ;;  %v29_v9 = vld [vmem:[#allocation2 + $0x6] sm:$0x3]  ;;  %v207_v10 = vld [vmem:[%s389_s1 + $0x3] ss:$0 sm:$0xff]  ;;  %v30_v11 = vld [vmem:[#allocation2 + $0x8] sm:$0x3] }
  0x17   :  { %171 = vst.msk [vmem:[#allocation5] sm:$0x3] %vm170_vm0, %v154_v3  ;;  %v157_v12 = vadd.f32 %v207_v10, %v29_v9  ;;  %v208_v13 = vld [vmem:[%s389_s1 + $0x4] ss:$0 sm:$0xff]  ;;  %v31_v14 = vld [vmem:[#allocation2 + $0xa] sm:$0x3] }
  0x18   :  { %v209_v15 = vld [vmem:[%s389_s1 + $0x5] ss:$0 sm:$0xff]  ;;  %172 = vst.msk [vmem:[#allocation5 + $0x2] sm:$0x3] %vm170_vm0, %v155_v7  ;;  %173 = vst.msk [vmem:[#allocation5 + $0x4] sm:$0x3] %vm170_vm0, %v156_v8  ;;  %v158_v16 = vadd.f32 %v208_v13, %v30_v11 }
  0x19   :  { %v159_v17 = vadd.f32 %v209_v15, %v31_v14  ;;  %v32_v18 = vld [vmem:[#allocation2 + $0xc] sm:$0x3]  ;;  %v210_v19 = vld [vmem:[%s389_s1 + $0x6] ss:$0 sm:$0xff]  ;;  %v33_v20 = vld [vmem:[#allocation2 + $0xe] sm:$0x3] }
  0x1a   :  { %174 = vst.msk [vmem:[#allocation5 + $0x6] sm:$0x3] %vm170_vm0, %v157_v12  ;;  %v160_v21 = vadd.f32 %v210_v19, %v32_v18  ;;  %v211_v22 = vld [vmem:[%s389_s1 + $0x7] ss:$0 sm:$0xff]  ;;  %v34_v23 = vld [vmem:[#allocation2 + $0x10] sm:$0x3] }
  0x1b   :  { %v212_v24 = vld [vmem:[%s389_s1 + $0x8] ss:$0 sm:$0xff]  ;;  %175 = vst.msk [vmem:[#allocation5 + $0x8] sm:$0x3] %vm170_vm0, %v158_v16  ;;  %176 = vst.msk [vmem:[#allocation5 + $0xa] sm:$0x3] %vm170_vm0, %v159_v17  ;;  %v161_v25 = vadd.f32 %v211_v22, %v33_v20 }
  0x1c   :  { %v162_v26 = vadd.f32 %v212_v24, %v34_v23  ;;  %v35_v27 = vld [vmem:[#allocation2 + $0x12] sm:$0x3]  ;;  %v213_v28 = vld [vmem:[%s389_s1 + $0x9] ss:$0 sm:$0xff]  ;;  %v36_v29 = vld [vmem:[#allocation2 + $0x14] sm:$0x3] }
  0x1d   :  { %177 = vst.msk [vmem:[#allocation5 + $0xc] sm:$0x3] %vm170_vm0, %v160_v21  ;;  %v163_v30 = vadd.f32 %v213_v28, %v35_v27  ;;  %v214_v31 = vld [vmem:[%s389_s1 + $0xa] ss:$0 sm:$0xff]  ;;  %v37_v32 = vld [vmem:[#allocation2 + $0x16] sm:$0x3] }
  0x1e   :  { %v215_v33 = vld [vmem:[%s389_s1 + $0xb] ss:$0 sm:$0xff]  ;;  %178 = vst.msk [vmem:[#allocation5 + $0xe] sm:$0x3] %vm170_vm0, %v161_v25  ;;  %179 = vst.msk [vmem:[#allocation5 + $0x10] sm:$0x3] %vm170_vm0, %v162_v26  ;;  %v164_v34 = vadd.f32 %v214_v31, %v36_v29 }
  0x1f   :  { %v165_v35 = vadd.f32 %v215_v33, %v37_v32  ;;  %v38_v36 = vld [vmem:[#allocation2 + $0x18] sm:$0x3]  ;;  %v216_v37 = vld [vmem:[%s389_s1 + $0xc] ss:$0 sm:$0xff]  ;;  %v39_v38 = vld [vmem:[#allocation2 + $0x1a] sm:$0x3] }
  0x20   :  { %180 = vst.msk [vmem:[#allocation5 + $0x12] sm:$0x3] %vm170_vm0, %v163_v30  ;;  %v166_v39 = vadd.f32 %v216_v37, %v38_v36  ;;  %v217_v40 = vld [vmem:[%s389_s1 + $0xd] ss:$0 sm:$0xff]  ;;  %v40_v41 = vld [vmem:[#allocation2 + $0x1c] sm:$0x3] }
  0x21   :  { %v218_v42 = vld [vmem:[%s389_s1 + $0xe] ss:$0 sm:$0xff]  ;;  %181 = vst.msk [vmem:[#allocation5 + $0x14] sm:$0x3] %vm170_vm0, %v164_v34  ;;  %182 = vst.msk [vmem:[#allocation5 + $0x16] sm:$0x3] %vm170_vm0, %v165_v35  ;;  %v167_v43 = vadd.f32 %v217_v40, %v39_v38 }
  0x22   :  { %v168_v44 = vadd.f32 %v218_v42, %v40_v41  ;;  %v41_v45 = vld [vmem:[#allocation2 + $0x1e] sm:$0x3]  ;;  %v219_v46 = vld [vmem:[%s389_s1 + $0xf] ss:$0 sm:$0xff]  ;;  %183 = vst.msk [vmem:[#allocation5 + $0x18] sm:$0x3] %vm170_vm0, %v166_v39 }
  0x23   :  { %v169_v47 = vadd.f32 %v219_v46, %v41_v45  ;;  %184 = vst.msk [vmem:[#allocation5 + $0x1a] sm:$0x3] %vm170_vm0, %v167_v43  ;;  %s246_s30 = scalar_lea.vmem %s193_s24, 512 }
  0x24   :  { %185 = vst.msk [vmem:[#allocation5 + $0x1c] sm:$0x3] %vm170_vm0, %v168_v44  ;;  %p247_p8 = scmp.ne.s32.totalorder %s193_s24, %s246_s30  ;;  %p252_p10 = scmp.lt.s32.totalorder %s246_s30, %s246_s30 }
  0x25   :  { %186 = vst.msk [vmem:[#allocation5 + $0x1e] sm:$0x3] %vm170_vm0, %v169_v47 }
  0x26   :  { %p253_p11 = por %p252_p10, %p251_p9 }
  0x28   :  { %p254_p12 = pnand %p253_p11, %p247_p8 }
  0x2a   :  { %257 = shalt.err (!%p254_p12)
}
  0x2b   :  { %s258_s1 = scalar_lea.hbm %s390_s2, 512 }
  0x2c   :  { %p259_p13 = scmp.ne.s32.totalorder %s390_s2, %s258_s1  ;;  %p262_p0 = scmp.lt.u32.totalorder %s258_s1, %s390_s2 }
  0x2e   :  { %p264_p1 = pnand %p262_p0, %p259_p13 }
  0x30   :  { %267 = shalt.err (!%p264_p1)
}
  0x31   :  { %198 = dma.vmem_to_hbm [thread:$0]  %s193_s24, 512, %s390_s2, [#allocation4], %s273_s19, %s273_s19, %s274_s20  }
  0x32   :  { %270 = dma.done.wait [#allocation4], 512  }
  0x33   :  { %271 = vsyncadd [#allocation4], 4294966784 }
  0x34   :  { %202 = vsyncpa [#allocation3], 1 }
  0x35   :  { %203 = vsyncpa [#allocation4], 1 }

</bundles_post_ra>
